<compile_context>
chip_gen: v7x
topology: tpu7x:2x2x1
jax: 0.10.0
libtpu: 0.0.40
codegen_flags: <defaults>
</compile_context>

<pallas_src>
import jax
import jax.numpy as jnp
from jax.experimental import pallas as pl
from jax.experimental.pallas import tpu as pltpu

ENCODER_HIDDEN_DIM = 500
LSTM_HIDDEN_DIM = 1000

_LANE = 128
_SUBLANE = 8


def _round_up(n, m):
    return ((n + m - 1) // m) * m


def _encoder_kernel(x_ref, w1_ref, b1_ref, w2_ref, b2_ref, o_ref):
    # Linear 1: bf16 MXU matmul, f32 accumulate; bias + ReLU in f32 (VPU).
    x = x_ref[...].astype(jnp.bfloat16)
    h = jnp.dot(x, w1_ref[...], preferred_element_type=jnp.float32)
    h = jnp.maximum(h + b1_ref[...], 0.0)          # b1 is (1, H1p) -> broadcast
    # Linear 2: bf16 on the MXU again, f32 accumulate, bias add in f32.
    out = jnp.dot(h.astype(jnp.bfloat16), w2_ref[...],
                  preferred_element_type=jnp.float32)
    o_ref[...] = (out + b2_ref[...]).astype(o_ref.dtype)


def prepare_encoder_params(w1, b1, w2, b2):
    """One-time parameter prep (hoisted out of the per-call path).

    Pads hidden dims to lane multiples (500 -> 512, 1000 -> 1024) and casts the
    weights to bf16.  Call once and cache the result next to the model params.

    w1 : [D, 500]   (transposed PyTorch weight, i.e. [in, out])
    b1 : [500]
    w2 : [500, 1000]
    b2 : [1000]
    """
    D, H1 = w1.shape
    H2 = w2.shape[1]
    H1p = _round_up(H1, _LANE)   # 500  -> 512
    H2p = _round_up(H2, _LANE)   # 1000 -> 1024
    # Zero padding is semantics-preserving: padded hidden columns are
    # ReLU(0 + 0) = 0 and padded w2 rows are 0, so the first H2 output columns
    # are unchanged.
    w1p = jnp.zeros((D, H1p), jnp.bfloat16).at[:, :H1].set(w1.astype(jnp.bfloat16))
    b1p = jnp.zeros((1, H1p), jnp.float32).at[:, :H1].set(b1.astype(jnp.float32))
    w2p = jnp.zeros((H1p, H2p), jnp.bfloat16).at[:H1, :H2].set(w2.astype(jnp.bfloat16))
    b2p = jnp.zeros((1, H2p), jnp.float32).at[:, :H2].set(b2.astype(jnp.float32))
    return w1p, b1p, w2p, b2p


def encoder_forward(x, w1p, b1p, w2p, b2p, *, out_features=LSTM_HIDDEN_DIM,
                    block_m=512, block_n=512, out_dtype=jnp.float32):
    """Encoder forward: ReLU(x @ w1 + b1) @ w2 + b2 -> [B, out_features].

    Takes the pre-padded params produced by prepare_encoder_params.
    """
    B, D = x.shape
    assert w1p.shape[0] == D
    H1p = w1p.shape[1]
    H2p = w2p.shape[1]

    # Balanced batch tiles: pad at most to the next multiple of 8 rows per
    # tile (instead of padding B up to a full block_m tile).
    num_m = pl.cdiv(B, block_m)
    tm = _round_up(pl.cdiv(B, num_m), _SUBLANE)
    Bp = num_m * tm

    # Output-column split: keeps both v7x TensorCores busy at small batch and
    # halves per-step resident w2; near-neutral on single-core v5e/v6e.
    tn = block_n if H2p % block_n == 0 else H2p
    num_n = H2p // tn

    x_in = x if Bp == B else jnp.zeros((Bp, D), x.dtype).at[:B].set(x)

    out = pl.pallas_call(
        _encoder_kernel,
        out_shape=jax.ShapeDtypeStruct((Bp, H2p), out_dtype),
        # N axis outermost (slow): each w2/b2 column half is DMA'd once and
        # stays VMEM-resident while the batch axis marches underneath it.
        grid=(num_n, num_m),
        in_specs=[
            pl.BlockSpec((tm, D), lambda j, i: (i, 0)),     # x tile over batch
            pl.BlockSpec((D, H1p), lambda j, i: (0, 0)),    # w1/b1 VMEM-resident
            pl.BlockSpec((1, H1p), lambda j, i: (0, 0)),
            pl.BlockSpec((H1p, tn), lambda j, i: (0, j)),   # w2/b2 column halves
            pl.BlockSpec((1, tn), lambda j, i: (0, j)),
        ],
        out_specs=pl.BlockSpec((tm, tn), lambda j, i: (i, j)),
        compiler_params=pltpu.CompilerParams(
            dimension_semantics=("parallel", "parallel"),
        ),
    )(x_in, w1p, b1p, w2p, b2p)

    # Trim batch/column padding.  Under jit with a downstream consumer (the
    # LSTM) this slice fuses away; the in-kernel stores remain full lane-dense
    # unmasked (tm, tn) blocks.
    return out[:B, :out_features]


def init_params(key, input_dim):
    """Deterministic synthetic params with PyTorch nn.Linear-like init."""
    k1, k2, k3, k4 = jax.random.split(key, 4)
    # PyTorch stores weight as [out, in]; we keep the transposed layout [in, out].
    s1 = 1.0 / jnp.sqrt(input_dim)
    s2 = 1.0 / jnp.sqrt(ENCODER_HIDDEN_DIM)
    w1 = jax.random.uniform(k1, (input_dim, ENCODER_HIDDEN_DIM), jnp.float32, -s1, s1)
    b1 = jax.random.uniform(k2, (ENCODER_HIDDEN_DIM,), jnp.float32, -s1, s1)
    w2 = jax.random.uniform(k3, (ENCODER_HIDDEN_DIM, LSTM_HIDDEN_DIM), jnp.float32, -s2, s2)
    b2 = jax.random.uniform(k4, (LSTM_HIDDEN_DIM,), jnp.float32, -s2, s2)
    return w1, b1, w2, b2


if __name__ == "__main__":
    key = jax.random.PRNGKey(0)
    k_x, k_p = jax.random.split(key)

    batch = 8
    input_dim = 32   # small synthetic input_dim
    x = jax.random.normal(k_x, (batch, input_dim), jnp.float32)

    w1, b1, w2, b2 = init_params(k_p, input_dim)

    # One-time parameter prep (cache this next to the params in a real model).
    w1p, b1p, w2p, b2p = prepare_encoder_params(w1, b1, w2, b2)

    out = encoder_forward(x, w1p, b1p, w2p, b2p)
    out = jax.block_until_ready(out)

    # Pure-JAX reference of the same forward pass, matching the kernel's
    # bf16-rounded MXU inputs with f32 accumulation.
    xr = x.astype(jnp.bfloat16).astype(jnp.float32)
    w1r = w1.astype(jnp.bfloat16).astype(jnp.float32)
    w2r = w2.astype(jnp.bfloat16).astype(jnp.float32)
    h = jnp.maximum(xr @ w1r + b1, 0.0)
    ref = h.astype(jnp.bfloat16).astype(jnp.float32) @ w2r + b2

    assert out.shape == (batch, LSTM_HIDDEN_DIM)
    assert jnp.allclose(out, ref, atol=3e-3, rtol=3e-3)

    print("KERNEL_OK")
</pallas_src>

<mosaic_0001>
module attributes {stable_mosaic.version = 11 : i64} {
  func.func @_encoder_kernel(%arg0: i32, %arg1: i32, %arg2: memref<8x32xf32, #tpu.memory_space<vmem>>, %arg3: memref<32x512xbf16, #tpu.memory_space<vmem>>, %arg4: memref<1x512xf32, #tpu.memory_space<vmem>>, %arg5: memref<512x512xbf16, #tpu.memory_space<vmem>>, %arg6: memref<1x512xf32, #tpu.memory_space<vmem>>, %arg7: memref<8x512xf32, #tpu.memory_space<vmem>>) attributes {dimension_semantics = [#tpu.dimension_semantics<parallel>, #tpu.dimension_semantics<parallel>], iteration_bounds = array<i64: 2, 1>, scalar_prefetch = 0 : i64, scratch_operands = 0 : i64, tpu.core_type = #tpu.core_type<tc>, window_params = [{transform_indices = @transform_0, window_bounds = array<i64: 8, 32>}, {pipeline_mode = #tpu.pipeline_mode<synchronous>, transform_indices = @transform_1, window_bounds = array<i64: 32, 512>}, {pipeline_mode = #tpu.pipeline_mode<synchronous>, transform_indices = @transform_2, window_bounds = array<i64: 1, 512>}, {transform_indices = @transform_3, window_bounds = array<i64: 512, 512>}, {transform_indices = @transform_4, window_bounds = array<i64: 1, 512>}, {transform_indices = @transform_5, window_bounds = array<i64: 8, 512>}]} {
    %c0 = arith.constant 0 : index
    %c0_0 = arith.constant 0 : index
    %0 = vector.load %arg2[%c0, %c0_0] : memref<8x32xf32, #tpu.memory_space<vmem>>, vector<8x32xf32>
    %1 = arith.truncf %0 : vector<8x32xf32> to vector<8x32xbf16>
    %c0_1 = arith.constant 0 : index
    %c0_2 = arith.constant 0 : index
    %2 = vector.load %arg3[%c0_1, %c0_2] : memref<32x512xbf16, #tpu.memory_space<vmem>>, vector<32x512xbf16>
    %cst = arith.constant dense<0.000000e+00> : vector<8x512xf32>
    %3 = tpu.matmul %1, %2, %cst {dimension_numbers = #tpu.dot_dimension_numbers<[1], [0], [0], [1], [0, 0, 1, 1], [], []>} : vector<8x32xbf16>, vector<32x512xbf16>, vector<8x512xf32> -> vector<8x512xf32>
    %c0_3 = arith.constant 0 : index
    %c0_4 = arith.constant 0 : index
    %4 = vector.load %arg4[%c0_3, %c0_4] : memref<1x512xf32, #tpu.memory_space<vmem>>, vector<1x512xf32>
    %5 = vector.broadcast %4 : vector<1x512xf32> to vector<8x512xf32>
    %6 = arith.addf %3, %5 : vector<8x512xf32>
    %cst_5 = arith.constant 0.000000e+00 : f32
    %7 = vector.broadcast %cst_5 : f32 to vector<8x512xf32>
    %8 = arith.maximumf %6, %7 : vector<8x512xf32>
    %9 = arith.truncf %8 : vector<8x512xf32> to vector<8x512xbf16>
    %c0_6 = arith.constant 0 : index
    %c0_7 = arith.constant 0 : index
    %10 = vector.load %arg5[%c0_6, %c0_7] : memref<512x512xbf16, #tpu.memory_space<vmem>>, vector<512x512xbf16>
    %cst_8 = arith.constant dense<0.000000e+00> : vector<8x512xf32>
    %11 = tpu.matmul %9, %10, %cst_8 {dimension_numbers = #tpu.dot_dimension_numbers<[1], [0], [0], [1], [0, 0, 1, 1], [], []>} : vector<8x512xbf16>, vector<512x512xbf16>, vector<8x512xf32> -> vector<8x512xf32>
    %c0_9 = arith.constant 0 : index
    %c0_10 = arith.constant 0 : index
    %12 = vector.load %arg6[%c0_9, %c0_10] : memref<1x512xf32, #tpu.memory_space<vmem>>, vector<1x512xf32>
    %13 = vector.broadcast %12 : vector<1x512xf32> to vector<8x512xf32>
    %14 = arith.addf %11, %13 : vector<8x512xf32>
    %c0_11 = arith.constant 0 : index
    %c0_12 = arith.constant 0 : index
    %15 = vector.load %arg7[%c0_11, %c0_12] : memref<8x512xf32, #tpu.memory_space<vmem>>, vector<8x512xf32>
    tpu.vector_store %arg7[%c0_11, %c0_12], %14 {strides = array<i32>} : memref<8x512xf32, #tpu.memory_space<vmem>>, vector<8x512xf32>,
    return
  }
  func.func @transform_0(%arg0: i32, %arg1: i32) -> (i32, i32) {
    %c0_i32 = arith.constant 0 : i32
    %c0_i32_0 = arith.constant 0 : i32
    return %arg1, %c0_i32 : i32, i32
  }
  func.func @transform_1(%arg0: i32, %arg1: i32) -> (i32, i32) {
    %c0_i32 = arith.constant 0 : i32
    %c0_i32_0 = arith.constant 0 : i32
    %c0_i32_1 = arith.constant 0 : i32
    return %c0_i32, %c0_i32_0 : i32, i32
  }
  func.func @transform_2(%arg0: i32, %arg1: i32) -> (i32, i32) {
    %c0_i32 = arith.constant 0 : i32
    %c0_i32_0 = arith.constant 0 : i32
    %c0_i32_1 = arith.constant 0 : i32
    return %c0_i32, %c0_i32_0 : i32, i32
  }
  func.func @transform_3(%arg0: i32, %arg1: i32) -> (i32, i32) {
    %c0_i32 = arith.constant 0 : i32
    %c0_i32_0 = arith.constant 0 : i32
    return %c0_i32, %arg0 : i32, i32
  }
  func.func @transform_4(%arg0: i32, %arg1: i32) -> (i32, i32) {
    %c0_i32 = arith.constant 0 : i32
    %c0_i32_0 = arith.constant 0 : i32
    return %c0_i32, %arg0 : i32, i32
  }
  func.func @transform_5(%arg0: i32, %arg1: i32) -> (i32, i32) {
    %c0_i32 = arith.constant 0 : i32
    return %arg1, %arg0 : i32, i32
  }
}

</mosaic_0001>

<bundles_post_ra>
// kernel: tpu_custom_call.1
= control target key start
LH: loop header
LB: loop body
LE: loop exit
PB: predicated region body
PF: predicated region fallthrough
CT: control target
= control target key end

     0   :  { %10 = vsyncpa [#allocation3], 0  ;;  %s2669_s0 = inlined_call_operand.hbm [shape: f32[8,32], index: 0, kind: input, shape index: {}]   ;;  %s2670_s1 = inlined_call_operand.hbm [shape: bf16[32,512], index: 1, kind: input, shape index: {}]   ;;  %s2671_s2 = inlined_call_operand.vmem [shape: f32[1,512], index: 2, kind: input, shape index: {}]   ;;  %s2672_s3 = inlined_call_operand.hbm [shape: bf16[512,1024], index: 3, kind: input, shape index: {}]   ;;  %s2673_s4 = inlined_call_operand.vmem [shape: f32[1,1024], index: 4, kind: input, shape index: {}]   ;;  %s2674_s5 = inlined_call_operand.hbm [shape: f32[8,1024], index: 5, kind: output, shape index: {}]  }
   0x1   :  { %11 = vsyncpa [#allocation6], 0 }
   0x2   :  { %12 = vsyncpa [#allocation4], 0 }
   0x3   :  { %14 = vsyncpa [#allocation4 + $0x1], 0  ;;  %s2242_s18 = smov 0   ;;  %s2244_s19 = smov 0  }
   0x4   :  { %s2246_s20 = smov 0   ;;  %s2248_s21 = smov 0  }
   0x5   :  { %s2250_s22 = smov 0   ;;  %s2252_s23 = smov 0  }
   0x6 LB: > { %s2273_s24 = sadd.s32 4294967295, %s2202_s23   ;;  %s1564_s25 = sadd.s32 4294967294, %s2202_s23   ;;  %s2202_s23 = sphi %s2252_s23, %s20_s23   ;;  %s2198_s22 = sphi %s2250_s22, %s2707_s22   ;;  %s2194_s21 = sphi %s2248_s21, %s2706_s21   ;;  %s2190_s20 = sphi %s2246_s20, %s2705_s20   ;;  %s2186_s19 = sphi %s2244_s19, %s2704_s19   ;;  %s2182_s18 = sphi %s2242_s18, %s2703_s18  }
   0x7   : > { %p114_p0 = scmp.ne.s32.totalorder %s2190_s20, %s2186_s19  ;;  %p115_p1 = scmp.eq.s32.totalorder %s2202_s23, 0 }
   0x8   : > { %p120_p2 = scmp.ne.s32.totalorder %s2186_s19, %s2182_s18  ;;  %p2675_p3 = scmp.eq.s32.totalorder %s2273_s24, 0 }
   0x9   : > { %p172_p4 = scmp.eq.s32.totalorder %s2273_s24, 1  ;;  %p2284_p5 = por %p115_p1, %p114_p0 }
   0xa   : > { %p178_p6 = scmp.eq.s32.totalorder %s1564_s25, 1  ;;  %p2290_p7 = por %p2675_p3, %p120_p2 }
   0xb   : > { %p2294_p8 = por %p172_p4, %p114_p0  ;;  %p1565_p10 = scmp.ge.s32.totalorder %s2202_s23, 1 }
   0xc   : > { %s2683_s28 = scalar_select %p2290_p7, 1, 0 }
   0xd   : > { %s2684_s29 = scalar_select %p2294_p8, 1, 0 }
   0xe   : > { %p2298_p9 = por %p178_p6, %p120_p2  ;;  %p185_p11 = scmp.lt.s32.totalorder %s2202_s23, 3 }
   0xf   : > { %s2204_s7 = smov [#allocation2]   ;;  %p1764_p1 = scmp.lt.s32.totalorder %s2202_s23, 2 }
  0x10   : > { %s2685_s30 = scalar_select %p2298_p9, 1, 0 }
  0x11   : > { %p2305_p13 = pnand %p1565_p10, %p185_p11  ;;  %s200_s8 = sshll.u32 %s2204_s7, 4  ;;  %s201_s8 = int_to_ptr.vmem [resolvable:$true] %s200_s8 }
  0x12   : > { %p2314_p4 = pnand %p1764_p1, %p2284_p5  ;;  %s2205_s10 = smov [#allocation5]  }
  0x13   : > { %s2686_s6 = scalar_select %p2305_p13, 1, 0 }
  0x14   : > { %p1747_p0 = pneg %p2305_p13  ;;  %s210_s11 = sshll.u32 %s2205_s10, 4  ;;  %s2324_s11 = int_to_ptr.vmem [resolvable:$true] %s210_s11 }
  0x15   : > { %s2687_s9 = scalar_select %p2314_p4, 1, 0 }
  0x16   : > { %p2320_p2 = pnand %p1747_p0, %p2675_p3  ;;  %s2026_s15 = scalar_lea.hbm %s2669_s0, 128 }
  0x17   : > { %p2027_p5 = scmp.ne.s32.totalorder %s2669_s0, %s2026_s15  ;;  %p2033_p1 = scmp.lt.u32.totalorder %s2026_s15, %s2669_s0 }
  0x18   : > { %p2028_p6 = pneg %p2320_p2 }
  0x1a   : > { %p2029_p10 = pnand %p2028_p6, %p2027_p5 }
  0x1c   : > { %p2030_p11 = pneg %p2029_p10 }
  0x1e   : > { %p2035_p0 = pnand %p2033_p1, %p2030_p11 }
  0x20   : > { %2038 = shalt.err (!%p2035_p0)
}
  0x21   : > { %s2039_s7 = scalar_lea.vmem %s201_s8, 128  ;;  %p2047_p8 = scmp.lt.s32.totalorder %s201_s8, %s201_s8 }
  0x22   : > { %p2040_p12 = scmp.ne.s32.totalorder %s201_s8, %s2039_s7  ;;  %p2048_p7 = scmp.lt.s32.totalorder %s2039_s7, %s2039_s7 }
  0x24   : > { %p2042_p3 = pnand %p2040_p12, %p2028_p6  ;;  %p2049_p13 = por %p2048_p7, %p2047_p8 }
  0x26   : > { %p2043_p9 = pneg %p2042_p3 }
  0x28   : > { %p2050_p4 = pnand %p2049_p13, %p2043_p9 }
  0x2a   : > { %2053 = shalt.err (!%p2050_p4)
}
  0x2b   : > { %1750 = dma.hbm_to_vmem [thread:$0]  (!%p2320_p2), %s2669_s0, 128, %s201_s8, [#allocation3]  }
  0x2c   : > { %s2054_s16 = scalar_lea.hbm %s2670_s1, 1024 }
  0x2d   : > { %p2055_p3 = scmp.ne.s32.totalorder %s2670_s1, %s2054_s16  ;;  %p2061_p9 = scmp.lt.u32.totalorder %s2054_s16, %s2670_s1 }
  0x2f   : > { %p2057_p7 = pnand %p2055_p3, %p2028_p6 }
  0x31   : > { %p2058_p8 = pneg %p2057_p7 }
  0x33   : > { %p2063_p12 = pnand %p2061_p9, %p2058_p8 }
  0x35   : > { %2066 = shalt.err (!%p2063_p12)
}
  0x36   : > { %s2067_s8 = scalar_lea.vmem %s2324_s11, 1024  ;;  %p2075_p10 = scmp.lt.s32.totalorder %s2324_s11, %s2324_s11 }
  0x37   : > { %p2068_p13 = scmp.ne.s32.totalorder %s2324_s11, %s2067_s8  ;;  %p2076_p11 = scmp.lt.s32.totalorder %s2067_s8, %s2067_s8 }
  0x39   : > { %p2070_p4 = pnand %p2068_p13, %p2028_p6  ;;  %p2077_p1 = por %p2076_p11, %p2075_p10 }
  0x3b   : > { %p2071_p5 = pneg %p2070_p4 }
  0x3d   : > { %p2078_p0 = pnand %p2077_p1, %p2071_p5 }
  0x3f   : > { %2081 = shalt.err (!%p2078_p0)
}
  0x40   : > { %s2680_s10 = smov 256   ;;  %s2681_s13 = smov 16  }
  0x41   : > { %1753 = dma.hbm_to_vmem [thread:$0]  (!%p2320_p2), %s2670_s1, 1024, %s2324_s11, [#allocation6], %s2680_s10, %s2680_s10, %s2681_s13  }
  0x42   : > { %s227_s16 = sand.u32 1, %s2202_s23   ;;  %s32_s17 = sadd.s32 1, %s2198_s22 }
  0x43   : > { %s229_s25 = sand.u32 1, %s2190_s20   ;;  %p34_p6 = scmp.ge.s32.totalorder %s32_s17, 2 }
  0x44   : > { %s1569_s27 = sshll.u32 %s229_s25, 10  ;;  %s1721_s7 = sshll.u32 %s2198_s22, 8 }
  0x45   : > { %s2709_s17 = smov (%p34_p6, %s32_s17), 0  ;;  %s2385_s12 = scalar_lea.hbm %s2672_s3, %s1721_s7 }
  0x46   : > { %s231_s11 = scalar_lea.vmem [#allocation7], %s1569_s27  ;;  %s104_s15 = ssub.s32 %s2198_s22, %s2709_s17 }
  0x47   : > { %s238_s14 = sshll.u32 %s231_s11, 4  ;;  %p2391_p2 = scmp.eq.s32.totalorder %s104_s15, 0  ;;  %s2389_s14 = int_to_ptr.vmem [resolvable:$true] %s238_s14 }
  0x48   : > { %s2395_s10 = scalar_lea.sflag [#allocation3], %s227_s16  ;;  %s2082_s13 = scalar_lea.hbm %s2385_s12, 16384 }
  0x49   : > { %p2083_p3 = scmp.ne.s32.totalorder %s2385_s12, %s2082_s13  ;;  %p2690_p7 = scmp.ne.s32.totalorder %s2687_s9, 0 }
  0x4a   : > { %s2087_s7 = scalar_lea.hbm %s2672_s3, 32768  ;;  %p2088_p13 = scmp.lt.u32.totalorder %s2385_s12, %s2672_s3 }
  0x4b   : > { %p2084_p8 = pneg %p2690_p7  ;;  %p2089_p4 = scmp.lt.u32.totalorder %s2087_s7, %s2082_s13 }
  0x4c   : > { %p2091_p10 = scmp.lt.u32.totalorder %s2082_s13, %s2385_s12 }
  0x4d   : > { %p2085_p9 = pnand %p2084_p8, %p2083_p3  ;;  %p2090_p5 = por %p2089_p4, %p2088_p13 }
  0x4f   : > { %p2086_p12 = pneg %p2085_p9  ;;  %p2092_p11 = por %p2091_p10, %p2090_p5 }
  0x51   : > { %p2093_p1 = pnand %p2092_p11, %p2086_p12 }
  0x53   : > { %2096 = shalt.err (!%p2093_p1)
}
  0x54   : > { %s2097_s16 = scalar_lea.vmem %s2389_s14, 16384  ;;  %s2208_s15 = smov [#allocation7]  }
  0x55   : > { %p2098_p0 = scmp.ne.s32.totalorder %s2389_s14, %s2097_s16  ;;  %s2102_s26 = sshll.u32 %s2208_s15, 4  ;;  %s2103_s26 = int_to_ptr.vmem [resolvable:$false] %s2102_s26 }
  0x56   : > { %s2104_s27 = scalar_lea.vmem %s2103_s26, 32768  ;;  %p2105_p9 = scmp.lt.s32.totalorder %s2389_s14, %s2103_s26 }
  0x57   : > { %p2100_p6 = pnand %p2098_p0, %p2084_p8  ;;  %p2106_p13 = scmp.lt.s32.totalorder %s2104_s27, %s2097_s16 }
  0x59   : > { %p2101_p3 = pneg %p2100_p6  ;;  %p2107_p4 = por %p2106_p13, %p2105_p9 }
  0x5b   : > { %p2108_p5 = pnand %p2107_p4, %p2101_p3 }
  0x5d   : > { %2111 = shalt.err (!%p2108_p5)
}
  0x5e   : > { %s2209_s13 = smov 512   ;;  %s2691_s7 = smov 16  }
  0x5f   : > { %s2692_s8 = smov 256   ;;  %s2693_s11 = sadd.s32 1, %s2190_s20 }
  0x60   : > { %1757 = dma.hbm_to_vmem [thread:$0]  (!%p2690_p7), %s2385_s12, 16384, %s2389_s14, %s2395_s10, %s2209_s13, %s2692_s8, %s2691_s7  }
  0x61   : > { %s2430_s15 = scalar_select %p2391_p2, %s2190_s20, %s2693_s11  }
  0x62   : > { %p2694_p8 = scmp.ne.s32.totalorder %s2686_s6, 0 }
  0x63   : > { %p2695_p12 = scmp.eq.s32.totalorder (!%p2694_p8), %s2273_s24, 0 }
  0x64   : > { %258 = sbr.rel (%p2694_p8) target bundleno = 640 (0x280), region = 40 }
  0x6b   : > { %2165 = dma.done.wait (%p2695_p12), [#allocation3], 128   ;;  %p2696_p10 = pmov %p2695_p12 }
  0x6d   : > { %2167 = vsyncadd (%p2696_p10), [#allocation3], 4294967168  ;;  %p2697_p11 = pmov %p2696_p10 }
  0x6e   : > { %p2698_p1 = pmov %p2696_p10 }
  0x6f   : > { %2169 = dma.done.wait (%p2697_p11), [#allocation6], 1024  }
  0x70   : > { %2171 = vsyncadd (%p2698_p1), [#allocation6], 4294966272  ;;  %s268_s9 = sand.u32 1, %s2273_s24   ;;  %s2444_s10 = sand.u32 1, %s2186_s19  }
  0x71   : > { %s1575_s6 = sshll.u32 %s2444_s10, 10  ;;  %s269_s12 = scalar_lea.sflag [#allocation3], %s268_s9 }
  0x72   : > { %s2447_s14 = scalar_lea.vmem [#allocation7], %s1575_s6  ;;  %p2699_p2 = scmp.ne.s32.totalorder %s2683_s28, 0 }
  0x74   : > { %2173 = dma.done.wait (%p2699_p2), %s269_s12, 16384  }
  0x75   : > { %2175 = vsyncadd (%p2699_p2), %s269_s12, 4294950912  ;;  %v2210_v0 = vmov 0   ;;  %v1822_v1 = vld [vmem:[#allocation5 + $0x4] ss:$16 sps:$4 sm:$0xff]   ;;  %v1824_v2 = vld [vmem:[#allocation5] ss:$16 sps:$4 sm:$0xff]  }
  0x76   : > { %419 = vmatprep.mubr.bf16.mxu0 %v2210_v0  ;;  %460 = vmatprep.mubr.bf16.mxu1 %v2210_v0  ;;  %v1825_v3 = vld [vmem:[#allocation5 + $0x24] ss:$16 sps:$4 sm:$0xff]   ;;  %v1827_v4 = vld [vmem:[#allocation5 + $0x20] ss:$16 sps:$4 sm:$0xff]   ;;  %v311_v5 = vld [vmem:[#allocation2] sm:$0xff]  ;;  %vm383_vm0 = vcmask 261120  }
  0x77   : > { %387 = vmatprep.subr.bf16.mxu0 %v1822_v1  ;;  %v1828_v6 = vld [vmem:[#allocation5 + $0xc] ss:$16 sps:$4 sm:$0xff]   ;;  %v1830_v7 = vld [vmem:[#allocation5 + $0x8] ss:$16 sps:$4 sm:$0xff]   ;;  %v312_v9 = vpack.c.bf16 %v311_v5, %v311_v5  ;;  %v1836_v11 = vld [vmem:[%s2447_s14 + $0x4] ss:$16 sps:$4 sm:$0xff]  }
  0x78   : > { %388 = vmatpush1.bf16.msra.mxu0 %v1824_v2  ;;  %428 = vmatprep.subr.bf16.mxu1 %v1828_v6  ;;  %v1831_v8 = vld [vmem:[#allocation5 + $0x2c] ss:$16 sps:$4 sm:$0xff]   ;;  %v1833_v10 = vld [vmem:[#allocation5 + $0x28] ss:$16 sps:$4 sm:$0xff]   ;;  %v1834_v12 = vld [vmem:[%s2447_s14] ss:$16 sps:$4 sm:$0xff]  }
  0x79   : > { %389 = vmatprep.subr.bf16.mxu0 %v1825_v3  ;;  %429 = vmatpush1.bf16.msra.mxu1 %v1830_v7  ;;  %v1839_v13 = vld [vmem:[%s2447_s14 + $0xc] ss:$16 sps:$4 sm:$0xff]   ;;  %v1842_v14 = vld [vmem:[%s2447_s14 + $0x24] ss:$16 sps:$4 sm:$0xff]   ;;  %v1837_v15 = vld [vmem:[%s2447_s14 + $0x8] ss:$16 sps:$4 sm:$0xff]  }
  0x7a   : > { %430 = vmatprep.subr.bf16.mxu1 %v1831_v8  ;;  %v1840_v16 = vld [vmem:[%s2447_s14 + $0x20] ss:$16 sps:$4 sm:$0xff]   ;;  %v1845_v17 = vld [vmem:[%s2447_s14 + $0x2c] ss:$16 sps:$4 sm:$0xff]   ;;  %v1848_v18 = vld [vmem:[%s2447_s14 + $0x44] ss:$16 sps:$4 sm:$0xff]  }
  0x7b   : > { %v1843_v19 = vld [vmem:[%s2447_s14 + $0x28] ss:$16 sps:$4 sm:$0xff]   ;;  %v1846_v20 = vld [vmem:[%s2447_s14 + $0x40] ss:$16 sps:$4 sm:$0xff]   ;;  %v1851_v21 = vld [vmem:[%s2447_s14 + $0x4c] ss:$16 sps:$4 sm:$0xff]  }
  0x7c   : > { %390 = vmatpush1.bf16.msra.mxu0 %v1827_v4  ;;  %v1854_v22 = vld [vmem:[%s2447_s14 + $0x64] ss:$16 sps:$4 sm:$0xff]   ;;  %v1849_v23 = vld [vmem:[%s2447_s14 + $0x48] ss:$16 sps:$4 sm:$0xff]   ;;  %v1852_v24 = vld [vmem:[%s2447_s14 + $0x60] ss:$16 sps:$4 sm:$0xff]  }
  0x7d   : > { %1267 = vmatprep.subr.bf16.mxu0 %v1836_v11  ;;  %431 = vmatpush1.bf16.msra.mxu1 %v1833_v10  ;;  %v1857_v25 = vld [vmem:[%s2447_s14 + $0x6c] ss:$16 sps:$4 sm:$0xff]   ;;  %v1860_v26 = vld [vmem:[%s2447_s14 + $0x84] ss:$16 sps:$4 sm:$0xff]   ;;  %v1855_v27 = vld [vmem:[%s2447_s14 + $0x68] ss:$16 sps:$4 sm:$0xff]  }
  0x7e   : > { %1349 = vmatprep.subr.bf16.mxu1 %v1839_v13  ;;  %v1858_v28 = vld [vmem:[%s2447_s14 + $0x80] ss:$16 sps:$4 sm:$0xff]   ;;  %v1863_v29 = vld [vmem:[%s2447_s14 + $0x8c] ss:$16 sps:$4 sm:$0xff]   ;;  %v1866_v30 = vld [vmem:[%s2447_s14 + $0xa4] ss:$16 sps:$4 sm:$0xff]   ;;  %v323_v13 = vlaneseq }
  0x7f   : > { %1586 = vmatmul.mubr.msk.bf16.vlgmr.msra.gmra.mrb[0].mxu0 %vm383_vm0, %v312_v9  ;;  %v1861_v31 = vld [vmem:[%s2447_s14 + $0x88] ss:$16 sps:$4 sm:$0xff]   ;;  %v1864_v32 = vld [vmem:[%s2447_s14 + $0xa0] ss:$16 sps:$4 sm:$0xff]   ;;  %v1869_v33 = vld [vmem:[%s2447_s14 + $0xac] ss:$16 sps:$4 sm:$0xff]  }
  0x80   : > { %1268 = vmatpush1.bf16.msra.mxu0 %v1834_v12  ;;  %1587 = vmatmul.mubr.msk.bf16.vlgmr.msra.gmra.mrb[0].mxu1 %vm383_vm0, %v312_v9  ;;  %v1872_v34 = vld [vmem:[%s2447_s14 + $0xc4] ss:$16 sps:$4 sm:$0xff]   ;;  %v1867_v35 = vld [vmem:[%s2447_s14 + $0xa8] ss:$16 sps:$4 sm:$0xff]   ;;  %v1870_v36 = vld [vmem:[%s2447_s14 + $0xc0] ss:$16 sps:$4 sm:$0xff]  }
  0x81   : > { %1269 = vmatprep.subr.bf16.mxu0 %v1842_v14  ;;  %1350 = vmatpush1.bf16.msra.mxu1 %v1837_v15  ;;  %v1875_v37 = vld [vmem:[%s2447_s14 + $0xcc] ss:$16 sps:$4 sm:$0xff]   ;;  %v1878_v38 = vld [vmem:[%s2447_s14 + $0xe4] ss:$16 sps:$4 sm:$0xff]   ;;  %v1873_v39 = vld [vmem:[%s2447_s14 + $0xc8] ss:$16 sps:$4 sm:$0xff]  }
  0x82   : > { %1351 = vmatprep.subr.bf16.mxu1 %v1845_v17  ;;  %v1876_v40 = vld [vmem:[%s2447_s14 + $0xe0] ss:$16 sps:$4 sm:$0xff]   ;;  %v1881_v41 = vld [vmem:[%s2447_s14 + $0xec] ss:$16 sps:$4 sm:$0xff]   ;;  %v1884_v42 = vld [vmem:[%s2447_s14 + $0x104] ss:$16 sps:$4 sm:$0xff]  }
  0x83   : > { %v1879_v43 = vld [vmem:[%s2447_s14 + $0xe8] ss:$16 sps:$4 sm:$0xff]   ;;  %v1882_v44 = vld [vmem:[%s2447_s14 + $0x100] ss:$16 sps:$4 sm:$0xff]   ;;  %v1887_v45 = vld [vmem:[%s2447_s14 + $0x10c] ss:$16 sps:$4 sm:$0xff]  }
  0x84   : > { %1270 = vmatpush1.bf16.msra.mxu0 %v1840_v16  ;;  %v1890_v46 = vld [vmem:[%s2447_s14 + $0x124] ss:$16 sps:$4 sm:$0xff]   ;;  %v1885_v47 = vld [vmem:[%s2447_s14 + $0x108] ss:$16 sps:$4 sm:$0xff]   ;;  %v1888_v48 = vld [vmem:[%s2447_s14 + $0x120] ss:$16 sps:$4 sm:$0xff]  }
  0x85   : > { %1271 = vmatprep.subr.bf16.mxu0 %v1848_v18  ;;  %1352 = vmatpush1.bf16.msra.mxu1 %v1843_v19  ;;  %v1893_v49 = vld [vmem:[%s2447_s14 + $0x12c] ss:$16 sps:$4 sm:$0xff]   ;;  %v1896_v50 = vld [vmem:[%s2447_s14 + $0x144] ss:$16 sps:$4 sm:$0xff]   ;;  %v1891_v51 = vld [vmem:[%s2447_s14 + $0x128] ss:$16 sps:$4 sm:$0xff]  }
  0x86   : > { %1353 = vmatprep.subr.bf16.mxu1 %v1851_v21  ;;  %v1894_v52 = vld [vmem:[%s2447_s14 + $0x140] ss:$16 sps:$4 sm:$0xff]   ;;  %v1899_v53 = vld [vmem:[%s2447_s14 + $0x14c] ss:$16 sps:$4 sm:$0xff]   ;;  %v1902_v54 = vld [vmem:[%s2447_s14 + $0x164] ss:$16 sps:$4 sm:$0xff]  }
  0x87   : > { %v1897_v55 = vld [vmem:[%s2447_s14 + $0x148] ss:$16 sps:$4 sm:$0xff]   ;;  %v1900_v56 = vld [vmem:[%s2447_s14 + $0x160] ss:$16 sps:$4 sm:$0xff]   ;;  %v1905_v57 = vld [vmem:[%s2447_s14 + $0x16c] ss:$16 sps:$4 sm:$0xff]  }
  0x88   : > { %1272 = vmatpush1.bf16.msra.mxu0 %v1846_v20  ;;  %v1908_v58 = vld [vmem:[%s2447_s14 + $0x184] ss:$16 sps:$4 sm:$0xff]   ;;  %v1903_v59 = vld [vmem:[%s2447_s14 + $0x168] ss:$16 sps:$4 sm:$0xff]   ;;  %v1906_v60 = vld [vmem:[%s2447_s14 + $0x180] ss:$16 sps:$4 sm:$0xff]  }
  0x89   : > { %1273 = vmatprep.subr.bf16.mxu0 %v1854_v22  ;;  %1354 = vmatpush1.bf16.msra.mxu1 %v1849_v23  ;;  %v1911_v61 = vld [vmem:[%s2447_s14 + $0x18c] ss:$16 sps:$4 sm:$0xff]   ;;  %v1914_v62 = vld [vmem:[%s2447_s14 + $0x1a4] ss:$16 sps:$4 sm:$0xff]   ;;  %v1909_v63 = vld [vmem:[%s2447_s14 + $0x188] ss:$16 sps:$4 sm:$0xff]  }
  0x8a   : > { %1355 = vmatprep.subr.bf16.mxu1 %v1857_v25  ;;  %v1912_v0 = vld [vmem:[%s2447_s14 + $0x1a0] ss:$16 sps:$4 sm:$0xff]   ;;  %v1917_v1 = vld [vmem:[%s2447_s14 + $0x1ac] ss:$16 sps:$4 sm:$0xff]   ;;  %v1915_v2 = vld [vmem:[%s2447_s14 + $0x1a8] ss:$16 sps:$4 sm:$0xff]  }
  0x8b   : > { %v1920_v3 = vld [vmem:[%s2447_s14 + $0x1c4] ss:$16 sps:$4 sm:$0xff]   ;;  %v1923_v4 = vld [vmem:[%s2447_s14 + $0x1cc] ss:$16 sps:$4 sm:$0xff]   ;;  %v1918_v5 = vld [vmem:[%s2447_s14 + $0x1c0] ss:$16 sps:$4 sm:$0xff]  }
  0x8c   : > { %1274 = vmatpush1.bf16.msra.mxu0 %v1852_v24  ;;  %v1921_v6 = vld [vmem:[%s2447_s14 + $0x1c8] ss:$16 sps:$4 sm:$0xff]   ;;  %v1926_v7 = vld [vmem:[%s2447_s14 + $0x1e4] ss:$16 sps:$4 sm:$0xff]   ;;  %v1929_v8 = vld [vmem:[%s2447_s14 + $0x1ec] ss:$16 sps:$4 sm:$0xff]  }
  0x8d   : > { %1275 = vmatprep.subr.bf16.mxu0 %v1860_v26  ;;  %1356 = vmatpush1.bf16.msra.mxu1 %v1855_v27  ;;  %v1924_v9 = vld [vmem:[%s2447_s14 + $0x1e0] ss:$16 sps:$4 sm:$0xff]   ;;  %v1927_v10 = vld [vmem:[%s2447_s14 + $0x1e8] ss:$16 sps:$4 sm:$0xff]   ;;  %v1932_v11 = vld [vmem:[%s2447_s14 + $0x204] ss:$16 sps:$4 sm:$0xff]  }
  0x8e   : > { %1357 = vmatprep.subr.bf16.mxu1 %v1863_v29  ;;  %v1935_v12 = vld [vmem:[%s2447_s14 + $0x20c] ss:$16 sps:$4 sm:$0xff]   ;;  %v2519_v14 = vshrl.u32 %v323_v13, 7  ;;  %v2525_v16 = vld [vmem:[%s2671_s2] sm:$0xf]  ;;  %s1577_s25 = sshll.u32 %s2194_s21, 2 }
  0x8f   : > { %v1992_v13 = vld [vmem:[%s2447_s14 + $0x344] ss:$16 sps:$4 sm:$0xff]   ;;  %p305_p7 = scmp.lt.s32.totalorder %s1577_s25, 7  ;;  %s1576_s13 = sshll.u32 %s2444_s10, 5 }
  0x90   : > { %1276 = vmatpush1.bf16.msra.mxu0 %v1858_v28  ;;  %v325_v15 = vsub.s32 0, %v2519_v14  ;;  %v329_v17 = vsub.s32 1, %v2519_v14  ;;  %v337_v19 = vsub.s32 3, %v2519_v14  ;;  %s1722_s7 = sshll.u32 %s2194_s21, 9  ;;  %s302_s8 = scalar_lea.vmem [#allocation8], %s1576_s13 }
  0x91   : > { %1277 = vmatprep.subr.bf16.mxu0 %v1866_v30  ;;  %1358 = vmatpush1.bf16.msra.mxu1 %v1861_v31  ;;  %s2711_s25 = smov (!%p305_p7, %s1577_s25), 7  ;;  %s1452_s11 = sshll.u32 %s302_s8, 4  ;;  %s2622_s11 = int_to_ptr.vmem [resolvable:$true] %s1452_s11 }
  0x92   : > { %1359 = vmatprep.subr.bf16.mxu1 %v1869_v33  ;;  %v326_v18 = vrot.slane %v2525_v16, %v325_v15  ;;  %v330_v20 = vrot.slane %v2525_v16, %v329_v17  ;;  %v338_v24 = vrot.slane %v2525_v16, %v337_v19  ;;  %s307_s27 = scalar_lea.vmem %s2673_s4, %s2711_s25  ;;  %s2620_s12 = scalar_lea.hbm %s2674_s5, %s1722_s7 }
  0x93   : > { %s1436_s21 = scalar_lea.sflag [#allocation4], %s2444_s10  ;;  %p2700_p6 = scmp.ne.s32.totalorder %s2684_s29, 0 }
  0x94   : > { %1278 = vmatpush1.bf16.msra.mxu0 %v1864_v32  ;;  %s2211_s24 = smov [#allocation8]  }
  0x95   : > { %1279 = vmatprep.subr.bf16.mxu0 %v1872_v34  ;;  %1360 = vmatpush1.bf16.msra.mxu1 %v1867_v35  ;;  %v1930_v35 = vld [vmem:[%s2447_s14 + $0x200] ss:$16 sps:$4 sm:$0xff]   ;;  %s2116_s28 = sshll.u32 %s2211_s24, 4  ;;  %s2117_s28 = int_to_ptr.vmem [resolvable:$false] %s2116_s28 }
  0x96   : > { %1361 = vmatprep.subr.bf16.mxu1 %v1875_v37  ;;  %s2118_s25 = scalar_lea.vmem %s2117_s28, 1024  ;;  %p2119_p13 = scmp.lt.s32.totalorder %s2622_s11, %s2117_s28 }
  0x98   : > { %1280 = vmatpush1.bf16.msra.mxu0 %v1870_v36  ;;  %v1933_v36 = vld [vmem:[%s2447_s14 + $0x208] ss:$16 sps:$4 sm:$0xff]  }
  0x99   : > { %1281 = vmatprep.subr.bf16.mxu0 %v1878_v38  ;;  %1362 = vmatpush1.bf16.msra.mxu1 %v1873_v39  ;;  %v1938_v39 = vld [vmem:[%s2447_s14 + $0x224] ss:$16 sps:$4 sm:$0xff]  }
  0x9a   : > { %1363 = vmatprep.subr.bf16.mxu1 %v1881_v41 }
  0x9c   : > { %1282 = vmatpush1.bf16.msra.mxu0 %v1876_v40  ;;  %v1941_v40 = vld [vmem:[%s2447_s14 + $0x22c] ss:$16 sps:$4 sm:$0xff]  }
  0x9d   : > { %1283 = vmatprep.subr.bf16.mxu0 %v1884_v42  ;;  %1364 = vmatpush1.bf16.msra.mxu1 %v1879_v43  ;;  %v1936_v43 = vld [vmem:[%s2447_s14 + $0x220] ss:$16 sps:$4 sm:$0xff]  }
  0x9e   : > { %1365 = vmatprep.subr.bf16.mxu1 %v1887_v45  ;;  %v1944_v45 = vld [vmem:[%s2447_s14 + $0x244] ss:$16 sps:$4 sm:$0xff]  }
  0xa0   : > { %1284 = vmatpush1.bf16.msra.mxu0 %v1882_v44  ;;  %v1939_v44 = vld [vmem:[%s2447_s14 + $0x228] ss:$16 sps:$4 sm:$0xff]  }
  0xa1   : > { %1285 = vmatprep.subr.bf16.mxu0 %v1890_v46  ;;  %1366 = vmatpush1.bf16.msra.mxu1 %v1885_v47  ;;  %v1947_v46 = vld [vmem:[%s2447_s14 + $0x24c] ss:$16 sps:$4 sm:$0xff]   ;;  %v1942_v47 = vld [vmem:[%s2447_s14 + $0x240] ss:$16 sps:$4 sm:$0xff]  }
  0xa2   : > { %1367 = vmatprep.subr.bf16.mxu1 %v1893_v49  ;;  %v1950_v49 = vld [vmem:[%s2447_s14 + $0x264] ss:$16 sps:$4 sm:$0xff]  }
  0xa4   : > { %1286 = vmatpush1.bf16.msra.mxu0 %v1888_v48  ;;  %v1945_v48 = vld [vmem:[%s2447_s14 + $0x248] ss:$16 sps:$4 sm:$0xff]  }
  0xa5   : > { %1287 = vmatprep.subr.bf16.mxu0 %v1896_v50  ;;  %1368 = vmatpush1.bf16.msra.mxu1 %v1891_v51  ;;  %v1953_v50 = vld [vmem:[%s2447_s14 + $0x26c] ss:$16 sps:$4 sm:$0xff]   ;;  %v1948_v51 = vld [vmem:[%s2447_s14 + $0x260] ss:$16 sps:$4 sm:$0xff]  }
  0xa6   : > { %1369 = vmatprep.subr.bf16.mxu1 %v1899_v53  ;;  %v1956_v53 = vld [vmem:[%s2447_s14 + $0x284] ss:$16 sps:$4 sm:$0xff]  }
  0xa8   : > { %1288 = vmatpush1.bf16.msra.mxu0 %v1894_v52  ;;  %v1951_v52 = vld [vmem:[%s2447_s14 + $0x268] ss:$16 sps:$4 sm:$0xff]  }
  0xa9   : > { %1289 = vmatprep.subr.bf16.mxu0 %v1902_v54  ;;  %1370 = vmatpush1.bf16.msra.mxu1 %v1897_v55  ;;  %v1959_v54 = vld [vmem:[%s2447_s14 + $0x28c] ss:$16 sps:$4 sm:$0xff]   ;;  %v1954_v55 = vld [vmem:[%s2447_s14 + $0x280] ss:$16 sps:$4 sm:$0xff]  }
  0xaa   : > { %1371 = vmatprep.subr.bf16.mxu1 %v1905_v57  ;;  %v1962_v57 = vld [vmem:[%s2447_s14 + $0x2a4] ss:$16 sps:$4 sm:$0xff]  }
  0xac   : > { %1290 = vmatpush1.bf16.msra.mxu0 %v1900_v56  ;;  %v1957_v56 = vld [vmem:[%s2447_s14 + $0x288] ss:$16 sps:$4 sm:$0xff]  }
  0xad   : > { %1291 = vmatprep.subr.bf16.mxu0 %v1908_v58  ;;  %1372 = vmatpush1.bf16.msra.mxu1 %v1903_v59  ;;  %v1965_v58 = vld [vmem:[%s2447_s14 + $0x2ac] ss:$16 sps:$4 sm:$0xff]   ;;  %v1960_v59 = vld [vmem:[%s2447_s14 + $0x2a0] ss:$16 sps:$4 sm:$0xff]  }
  0xae   : > { %1373 = vmatprep.subr.bf16.mxu1 %v1911_v61  ;;  %v1968_v61 = vld [vmem:[%s2447_s14 + $0x2c4] ss:$16 sps:$4 sm:$0xff]  }
  0xb0   : > { %1292 = vmatpush1.bf16.msra.mxu0 %v1906_v60  ;;  %v1963_v60 = vld [vmem:[%s2447_s14 + $0x2a8] ss:$16 sps:$4 sm:$0xff]  }
  0xb1   : > { %1293 = vmatprep.subr.bf16.mxu0 %v1914_v62  ;;  %1374 = vmatpush1.bf16.msra.mxu1 %v1909_v63  ;;  %v1971_v62 = vld [vmem:[%s2447_s14 + $0x2cc] ss:$16 sps:$4 sm:$0xff]   ;;  %v1966_v63 = vld [vmem:[%s2447_s14 + $0x2c0] ss:$16 sps:$4 sm:$0xff]  }
  0xb2   : > { %1375 = vmatprep.subr.bf16.mxu1 %v1917_v1  ;;  %v1974_v1 = vld [vmem:[%s2447_s14 + $0x2e4] ss:$16 sps:$4 sm:$0xff]  }
  0xb4   : > { %1294 = vmatpush1.bf16.msra.mxu0 %v1912_v0  ;;  %v1969_v0 = vld [vmem:[%s2447_s14 + $0x2c8] ss:$16 sps:$4 sm:$0xff]  }
  0xb5   : > { %1376 = vmatpush1.bf16.msra.mxu1 %v1915_v2  ;;  %1295 = vmatprep.subr.bf16.mxu0 %v1920_v3  ;;  %v1977_v2 = vld [vmem:[%s2447_s14 + $0x2ec] ss:$16 sps:$4 sm:$0xff]   ;;  %v1972_v3 = vld [vmem:[%s2447_s14 + $0x2e0] ss:$16 sps:$4 sm:$0xff]  }
  0xb6   : > { %1377 = vmatprep.subr.bf16.mxu1 %v1923_v4  ;;  %v1975_v4 = vld [vmem:[%s2447_s14 + $0x2e8] ss:$16 sps:$4 sm:$0xff]  }
  0xb8   : > { %1296 = vmatpush1.bf16.msra.mxu0 %v1918_v5  ;;  %v1980_v5 = vld [vmem:[%s2447_s14 + $0x304] ss:$16 sps:$4 sm:$0xff]  }
  0xb9   : > { %1378 = vmatpush1.bf16.msra.mxu1 %v1921_v6  ;;  %1297 = vmatprep.subr.bf16.mxu0 %v1926_v7  ;;  %v1983_v6 = vld [vmem:[%s2447_s14 + $0x30c] ss:$16 sps:$4 sm:$0xff]   ;;  %v1978_v7 = vld [vmem:[%s2447_s14 + $0x300] ss:$16 sps:$4 sm:$0xff]  }
  0xba   : > { %1379 = vmatprep.subr.bf16.mxu1 %v1929_v8  ;;  %v1981_v8 = vld [vmem:[%s2447_s14 + $0x308] ss:$16 sps:$4 sm:$0xff]  }
  0xbc   : > { %1298 = vmatpush1.bf16.msra.mxu0 %v1924_v9  ;;  %v1986_v9 = vld [vmem:[%s2447_s14 + $0x324] ss:$16 sps:$4 sm:$0xff]  }
  0xbd   : > { %1380 = vmatpush1.bf16.msra.mxu1 %v1927_v10  ;;  %1308 = vmatprep.subr.bf16.mxu0 %v1932_v11  ;;  %v1989_v10 = vld [vmem:[%s2447_s14 + $0x32c] ss:$16 sps:$4 sm:$0xff]   ;;  %v1984_v11 = vld [vmem:[%s2447_s14 + $0x320] ss:$16 sps:$4 sm:$0xff]  }
  0xbe   : > { %1390 = vmatprep.subr.bf16.mxu1 %v1935_v12  ;;  %v1987_v12 = vld [vmem:[%s2447_s14 + $0x328] ss:$16 sps:$4 sm:$0xff]  }
 0x152   : > { %v421_v21 = vpop.f32.mrb[0].mxu0 }
 0x153   : > { %v422_v22 = vadd.f32 %v421_v21, %v326_v18  ;;  %v423_v23 = vpop.f32.mrb[1].mxu0  ;;  %v2538_v29 = vpop.f32.mrb[0].mxu1  ;;  %v1995_v18 = vld [vmem:[%s2447_s14 + $0x34c] ss:$16 sps:$4 sm:$0xff]   ;;  %v1993_v21 = vld [vmem:[%s2447_s14 + $0x348] ss:$16 sps:$4 sm:$0xff]  }
 0x154   : > { %v424_v25 = vadd.f32 %v423_v23, %v330_v20  ;;  %v425_v26 = vpop.f32.mrb[2].mxu0  ;;  %v464_v31 = vpop.f32.mrb[1].mxu1  ;;  %v1990_v20 = vld [vmem:[%s2447_s14 + $0x340] ss:$16 sps:$4 sm:$0xff]   ;;  %v2001_v23 = vld [vmem:[%s2447_s14 + $0x36c] ss:$16 sps:$4 sm:$0xff]  }
 0x155   : > { %v469_v27 = vmax.f32 %v422_v22, 0.0  ;;  %v426_v28 = vpop.f32.mrb[3].mxu0  ;;  %v465_v32 = vadd.f32 %v464_v31, %v338_v24  ;;  %v466_v33 = vpop.f32.mrb[2].mxu1  ;;  %v1998_v22 = vld [vmem:[%s2447_s14 + $0x364] ss:$16 sps:$4 sm:$0xff]   ;;  %v333_v31 = vsub.s32 2, %v2519_v14 }
 0x156   : > { %v470_v30 = vmax.f32 %v424_v25, 0.0  ;;  %v467_v37 = vpop.f32.mrb[3].mxu1  ;;  %v1996_v24 = vld [vmem:[%s2447_s14 + $0x360] ss:$16 sps:$4 sm:$0xff]   ;;  %v1999_v25 = vld [vmem:[%s2447_s14 + $0x368] ss:$16 sps:$4 sm:$0xff]  }
 0x157   : > { %v473_v38 = vpack.c.bf16 %v469_v27, %v469_v27  ;;  %v472_v41 = vmax.f32 %v465_v32, 0.0  ;;  %v2004_v26 = vld [vmem:[%s2447_s14 + $0x384] ss:$16 sps:$4 sm:$0xff]   ;;  %v2007_v27 = vld [vmem:[%s2447_s14 + $0x38c] ss:$16 sps:$4 sm:$0xff]  }
 0x158   : > { %v474_v34 = vpack.c.bf16 %v470_v30, %v470_v30  ;;  %v2002_v28 = vld [vmem:[%s2447_s14 + $0x380] ss:$16 sps:$4 sm:$0xff]   ;;  %v2005_v30 = vld [vmem:[%s2447_s14 + $0x388] ss:$16 sps:$4 sm:$0xff]   ;;  %v2010_v32 = vld [vmem:[%s2447_s14 + $0x3a4] ss:$16 sps:$4 sm:$0xff]  }
 0x159   : > { %v476_v42 = vpack.c.bf16 %v472_v41, %v472_v41  ;;  %v2013_v33 = vld [vmem:[%s2447_s14 + $0x3ac] ss:$16 sps:$4 sm:$0xff]   ;;  %v2016_v37 = vld [vmem:[%s2447_s14 + $0x3c4] ss:$16 sps:$4 sm:$0xff]  }
 0x15a   : > { %1299 = vmatprep.mubr.bf16.mxu0 %v474_v34  ;;  %1381 = vmatprep.mubr.bf16.mxu1 %v474_v34  ;;  %v2008_v34 = vld [vmem:[%s2447_s14 + $0x3a0] ss:$16 sps:$4 sm:$0xff]  }
 0x15b   : > { %1300 = vmatmul.mubr.bf16.vlgmr.msra.gmra.mrb[4].mxu0 %v473_v38  ;;  %1382 = vmatmul.mubr.bf16.vlgmr.msra.gmra.mrb[4].mxu1 %v473_v38  ;;  %v2019_v38 = vld [vmem:[%s2447_s14 + $0x3cc] ss:$16 sps:$4 sm:$0xff]  }
 0x15c   : > { %1309 = vmatpush1.bf16.msra.mxu0 %v1930_v35  ;;  %1391 = vmatpush1.bf16.msra.mxu1 %v1933_v36  ;;  %v2011_v35 = vld [vmem:[%s2447_s14 + $0x3a8] ss:$16 sps:$4 sm:$0xff]   ;;  %v334_v36 = vrot.slane %v2525_v16, %v333_v31  ;;  %v2020_v16 = vld [vmem:[%s2447_s14 + $0x3e0] ss:$16 sps:$4 sm:$0xff]  }
 0x15d   : > { %1310 = vmatprep.subr.bf16.mxu0 %v1938_v39  ;;  %1392 = vmatprep.subr.bf16.mxu1 %v1941_v40  ;;  %v2014_v39 = vld [vmem:[%s2447_s14 + $0x3c0] ss:$16 sps:$4 sm:$0xff]   ;;  %v2017_v40 = vld [vmem:[%s2447_s14 + $0x3c8] ss:$16 sps:$4 sm:$0xff]  }
 0x15e   : > { %1340 = vmatprep.mubr.bf16.mxu0 %v476_v42  ;;  %1422 = vmatprep.mubr.bf16.mxu1 %v476_v42  ;;  %v463_v41 = vadd.f32 %v2538_v29, %v334_v36  ;;  %v2022_v42 = vld [vmem:[%s2447_s14 + $0x3e4] ss:$16 sps:$4 sm:$0xff]   ;;  %v605_v29 = vld [vmem:[%s307_s27] sm:$0xf] }
 0x160   : > { %1311 = vmatpush1.bf16.msra.mxu0 %v1936_v43  ;;  %1393 = vmatpush1.bf16.msra.mxu1 %v1939_v44  ;;  %v2025_v43 = vld [vmem:[%s2447_s14 + $0x3ec] ss:$16 sps:$4 sm:$0xff]   ;;  %v2023_v44 = vld [vmem:[%s2447_s14 + $0x3e8] ss:$16 sps:$4 sm:$0xff]   ;;  %s2112_s14 = scalar_lea.vmem %s2622_s11, 512 }
 0x161   : > { %1312 = vmatprep.subr.bf16.mxu0 %v1944_v45  ;;  %1394 = vmatprep.subr.bf16.mxu1 %v1947_v46  ;;  %v471_v45 = vmax.f32 %v463_v41, 0.0  ;;  %p2113_p0 = scmp.ne.s32.totalorder %s2622_s11, %s2112_s14  ;;  %p2120_p4 = scmp.lt.s32.totalorder %s2118_s25, %s2112_s14 }
 0x163   : > { %v475_v46 = vpack.c.bf16 %v471_v45, %v471_v45  ;;  %p2114_p3 = pnand %p2113_p0, %p2700_p6  ;;  %p2121_p5 = por %p2120_p4, %p2119_p13 }
 0x164   : > { %1313 = vmatpush1.bf16.msra.mxu0 %v1942_v47  ;;  %1395 = vmatpush1.bf16.msra.mxu1 %v1945_v48  ;;  %v610_v47 = vrot.slane %v605_v29, %v325_v15  ;;  %v618_v48 = vrot.slane %v605_v29, %v333_v31 }
 0x165   : > { %1314 = vmatprep.subr.bf16.mxu0 %v1950_v49  ;;  %1396 = vmatprep.subr.bf16.mxu1 %v1953_v50  ;;  %v614_v49 = vrot.slane %v605_v29, %v329_v17  ;;  %v622_v50 = vrot.slane %v605_v29, %v337_v19  ;;  %p2115_p9 = pneg %p2114_p3 }
 0x167   : > { %p2122_p8 = pnand %p2121_p5, %p2115_p9 }
 0x168   : > { %1315 = vmatpush1.bf16.msra.mxu0 %v1948_v51  ;;  %1397 = vmatpush1.bf16.msra.mxu1 %v1951_v52 }
 0x169   : > { %1316 = vmatprep.subr.bf16.mxu0 %v1956_v53  ;;  %1398 = vmatprep.subr.bf16.mxu1 %v1959_v54 }
 0x16c   : > { %1317 = vmatpush1.bf16.msra.mxu0 %v1954_v55  ;;  %1399 = vmatpush1.bf16.msra.mxu1 %v1957_v56 }
 0x16d   : > { %1318 = vmatprep.subr.bf16.mxu0 %v1962_v57  ;;  %1400 = vmatprep.subr.bf16.mxu1 %v1965_v58 }
 0x170   : > { %1319 = vmatpush1.bf16.msra.mxu0 %v1960_v59  ;;  %1401 = vmatpush1.bf16.msra.mxu1 %v1963_v60 }
 0x171   : > { %1320 = vmatprep.subr.bf16.mxu0 %v1968_v61  ;;  %1402 = vmatprep.subr.bf16.mxu1 %v1971_v62 }
 0x174   : > { %1321 = vmatpush1.bf16.msra.mxu0 %v1966_v63  ;;  %1403 = vmatpush1.bf16.msra.mxu1 %v1969_v0 }
 0x175   : > { %1322 = vmatprep.subr.bf16.mxu0 %v1974_v1  ;;  %1404 = vmatprep.subr.bf16.mxu1 %v1977_v2 }
 0x178   : > { %1323 = vmatpush1.bf16.msra.mxu0 %v1972_v3  ;;  %1405 = vmatpush1.bf16.msra.mxu1 %v1975_v4 }
 0x179   : > { %1324 = vmatprep.subr.bf16.mxu0 %v1980_v5  ;;  %1406 = vmatprep.subr.bf16.mxu1 %v1983_v6 }
 0x17c   : > { %1325 = vmatpush1.bf16.msra.mxu0 %v1978_v7  ;;  %1407 = vmatpush1.bf16.msra.mxu1 %v1981_v8 }
 0x17d   : > { %1326 = vmatprep.subr.bf16.mxu0 %v1986_v9  ;;  %1408 = vmatprep.subr.bf16.mxu1 %v1989_v10 }
 0x180   : > { %1327 = vmatpush1.bf16.msra.mxu0 %v1984_v11  ;;  %1409 = vmatpush1.bf16.msra.mxu1 %v1987_v12 }
 0x181   : > { %1328 = vmatprep.subr.bf16.mxu0 %v1992_v13  ;;  %1410 = vmatprep.subr.bf16.mxu1 %v1995_v18 }
 0x184   : > { %1329 = vmatpush1.bf16.msra.mxu0 %v1990_v20  ;;  %1411 = vmatpush1.bf16.msra.mxu1 %v1993_v21 }
 0x185   : > { %1330 = vmatprep.subr.bf16.mxu0 %v1998_v22  ;;  %1412 = vmatprep.subr.bf16.mxu1 %v2001_v23 }
 0x188   : > { %1331 = vmatpush1.bf16.msra.mxu0 %v1996_v24  ;;  %1413 = vmatpush1.bf16.msra.mxu1 %v1999_v25 }
 0x189   : > { %1332 = vmatprep.subr.bf16.mxu0 %v2004_v26  ;;  %1414 = vmatprep.subr.bf16.mxu1 %v2007_v27 }
 0x18c   : > { %1333 = vmatpush1.bf16.msra.mxu0 %v2002_v28  ;;  %1415 = vmatpush1.bf16.msra.mxu1 %v2005_v30 }
 0x18d   : > { %1334 = vmatprep.subr.bf16.mxu0 %v2010_v32  ;;  %1416 = vmatprep.subr.bf16.mxu1 %v2013_v33 }
 0x190   : > { %1335 = vmatpush1.bf16.msra.mxu0 %v2008_v34  ;;  %1417 = vmatpush1.bf16.msra.mxu1 %v2011_v35 }
 0x191   : > { %1336 = vmatprep.subr.bf16.mxu0 %v2016_v37  ;;  %1418 = vmatprep.subr.bf16.mxu1 %v2019_v38 }
 0x194   : > { %1337 = vmatpush1.bf16.msra.mxu0 %v2014_v39  ;;  %1419 = vmatpush1.bf16.msra.mxu1 %v2017_v40 }
 0x195   : > { %1338 = vmatprep.subr.bf16.mxu0 %v2022_v42  ;;  %1420 = vmatprep.subr.bf16.mxu1 %v2025_v43 }
 0x198   : > { %1339 = vmatpush1.bf16.msra.mxu0 %v2020_v16  ;;  %1421 = vmatpush1.bf16.msra.mxu1 %v2023_v44 }
 0x19b   : > { %1341 = vmatmul.mubr.bf16.vlgmr.msra.gmra.mrb[4].mxu0 %v475_v46  ;;  %1423 = vmatmul.mubr.bf16.vlgmr.msra.gmra.mrb[4].mxu1 %v475_v46 }
 0x26e   : > { %v1342_v51 = vpop.f32.mrb[4].mxu0  ;;  %v1424_v52 = vpop.f32.mrb[4].mxu1 }
 0x26f   : > { %v1723_v53 = vadd.f32 %v1342_v51, %v610_v47  ;;  %v1725_v54 = vadd.f32 %v1424_v52, %v618_v48  ;;  %v1344_v55 = vpop.f32.mrb[5].mxu0  ;;  %v1426_v56 = vpop.f32.mrb[5].mxu1 }
 0x270   : > { %v1724_v57 = vadd.f32 %v1344_v55, %v614_v49  ;;  %v1726_v15 = vadd.f32 %v1426_v56, %v622_v50  ;;  %v1346_v58 = vpop.f32.mrb[6].mxu0  ;;  %v1428_v59 = vpop.f32.mrb[6].mxu1 }
 0x271   : > { %1431 = vst [vmem:[%s302_s8] sm:$0xff] %v1723_v53  ;;  %1433 = vst [vmem:[%s302_s8 + $0x10] sm:$0xff] %v1725_v54  ;;  %v1347_v14 = vpop.f32.mrb[7].mxu0  ;;  %v1429_v17 = vpop.f32.mrb[7].mxu1 }
 0x272   : > { %1432 = vst [vmem:[%s302_s8 + $0x8] sm:$0xff] %v1724_v57  ;;  %1434 = vst [vmem:[%s302_s8 + $0x18] sm:$0xff] %v1726_v15 }
 0x273   : > { %2125 = shalt.err (!%p2122_p8)
}
 0x274   : > { %s2126_s10 = scalar_lea.hbm %s2620_s12, 512  ;;  %s2130_s27 = scalar_lea.hbm %s2674_s5, 1024 }
 0x275   : > { %p2127_p12 = scmp.ne.s32.totalorder %s2620_s12, %s2126_s10  ;;  %p2131_p1 = scmp.lt.u32.totalorder %s2620_s12, %s2674_s5 }
 0x276   : > { %p2132_p2 = scmp.lt.u32.totalorder %s2130_s27, %s2126_s10  ;;  %p2134_p0 = scmp.lt.u32.totalorder %s2126_s10, %s2620_s12 }
 0x277   : > { %p2128_p10 = pnand %p2127_p12, %p2700_p6 }
 0x278   : > { %p2133_p7 = por %p2132_p2, %p2131_p1 }
 0x279   : > { %p2129_p11 = pneg %p2128_p10 }
 0x27a   : > { %p2135_p3 = por %p2134_p0, %p2133_p7 }
 0x27c   : > { %p2136_p9 = pnand %p2135_p3, %p2129_p11 }
 0x27e   : > { %2139 = shalt.err (!%p2136_p9)
}
 0x27f   : > { %1745 = dma.vmem_to_hbm [thread:$0]  (%p2700_p6), %s2622_s11, 512, %s2620_s12, %s1436_s21  }
 0x280 PF: > { %s1464_s8 = sand.u32 1, %s2182_s18   ;;  %p2701_p13 = scmp.ne.s32.totalorder %s2685_s30, 0 }
 0x281   : > { %p2702_p4 = scmp.ge.s32.totalorder %s2202_s23, 2  ;;  %s1465_s9 = scalar_lea.sflag [#allocation4], %s1464_s8 }
 0x283   : > { %p1759_p5 = pnand %p2702_p4, %p2701_p13 }
 0x285   : > { %2177 = dma.done.wait (!%p1759_p5), %s1465_s9, 512  }
 0x286   : > { %2179 = vsyncadd (!%p1759_p5), %s1465_s9, 4294966784  ;;  %s20_s23 = sadd.s32 1, %s2202_s23   ;;  %s2703_s18 = smov %s2186_s19 }
 0x287   : > { %p17_p8 = scmp.ge.s32.totalorder %s20_s23, 4   ;;  %s2704_s19 = smov %s2190_s20 }
 0x288   : > { %s2705_s20 = smov %s2430_s15  ;;  %s2706_s21 = smov %s2198_s22 }
 0x289   : > { %s2707_s22 = smov %s2709_s17  ;;  %19 = sbr.rel (!%p17_p8) target bundleno = 6 (0x6), region = 96 }
 0x290   :  { %1470 = vsyncpa [#allocation3], 1 }
 0x291   :  { %1472 = vsyncpa [#allocation3 + $0x1], 1 }
 0x292   :  { %1473 = vsyncpa [#allocation6], 1 }
 0x293   :  { %1474 = vsyncpa [#allocation4], 1 }
 0x294   :  { %1476 = vsyncpa [#allocation4 + $0x1], 1 }

</bundles_post_ra>
